<compile_context>
chip_gen: v6e
topology: v6e:2x2x1
jax: 0.10.0
libtpu: 0.0.40
codegen_flags: <defaults>
</compile_context>

<pallas_src>
import math

import jax
import jax.numpy as jnp
from jax.experimental import pallas as pl
from jax.experimental.pallas import tpu as pltpu


def actor_kernel(obs_ref, w1_ref, b1_ref, w2_ref, b2_ref, w3_ref, b3_ref, out_ref):
    # Weights are bf16 (resident in VMEM for the whole grid); biases are f32.
    h = obs_ref[...].astype(jnp.bfloat16)                                      # (TB, S)
    h = jnp.dot(h, w1_ref[...], preferred_element_type=jnp.float32) + b1_ref[...]
    h = jnp.maximum(h, 0.0)                                                    # relu (f32)
    h = jnp.dot(h.astype(jnp.bfloat16), w2_ref[...],
                preferred_element_type=jnp.float32) + b2_ref[...]
    h = jnp.maximum(h, 0.0)                                                    # relu (f32)
    o = jnp.dot(h.astype(jnp.bfloat16), w3_ref[...],
                preferred_element_type=jnp.float32) + b3_ref[...]
    out_ref[...] = jnp.tanh(o)                                                 # Actor's tanh (f32)


def actor_forward(obs, params, *, block_b=256):
    """Fused Actor forward. Tiles the batch; weights stay resident in VMEM."""
    w1, b1, w2, b2, w3, b3 = params
    B, S = obs.shape
    A = w3.shape[1]

    # Batch tile: multiple of 8 sublanes, capped at block_b (256 rows ~ 0.5 MiB acts).
    tb = min(block_b, pl.cdiv(B, 8) * 8)
    Bp = pl.cdiv(B, tb) * tb
    if Bp != B:
        obs = jnp.pad(obs, ((0, Bp - B), (0, 0)))
    grid = (Bp // tb,)

    def const_spec(shape):
        # Same block index on every grid step -> block stays VMEM-resident.
        return pl.BlockSpec(shape, lambda i: (0,) * len(shape))

    out = pl.pallas_call(
        actor_kernel,
        out_shape=jax.ShapeDtypeStruct((Bp, A), jnp.float32),
        grid=grid,
        in_specs=[
            pl.BlockSpec((tb, S), lambda i: (i, 0)),
            const_spec(w1.shape), const_spec(b1.shape),
            const_spec(w2.shape), const_spec(b2.shape),
            const_spec(w3.shape), const_spec(b3.shape),
        ],
        out_specs=pl.BlockSpec((tb, A), lambda i: (i, 0)),
        compiler_params=pltpu.CompilerParams(
            dimension_semantics=("parallel",),  # shard batch tiles across TCs on v7x
        ),
    )(obs, w1, b1, w2, b2, w3, b3)
    return out[:B] if Bp != B else out


def init_linear(key, in_size, out_size):
    """Deterministic init mimicking torch.nn.Linear default (U[-1/sqrt(in), 1/sqrt(in)]).
    Weight returned as (in, out) in bf16; bias as (1, out) in f32."""
    kw, kb = jax.random.split(key)
    bound = 1.0 / math.sqrt(in_size)
    w = jax.random.uniform(kw, (in_size, out_size), jnp.float32, -bound, bound)
    b = jax.random.uniform(kb, (1, out_size), jnp.float32, -bound, bound)
    return w.astype(jnp.bfloat16), b


def make_actor_params(key, state_dim, action_dim, hidden=256):
    k1, k2, k3 = jax.random.split(key, 3)
    w1, b1 = init_linear(k1, state_dim, hidden)
    w2, b2 = init_linear(k2, hidden, hidden)
    w3, b3 = init_linear(k3, hidden, action_dim)
    return (w1, b1, w2, b2, w3, b3)


def actor_reference(obs, params):
    """Pure-JAX reference mirroring the kernel's dtype handling (bf16 matmuls, f32 acc)."""
    w1, b1, w2, b2, w3, b3 = params
    h = obs.astype(jnp.bfloat16)
    h = jnp.maximum(jnp.dot(h, w1, preferred_element_type=jnp.float32) + b1, 0.0)
    h = jnp.maximum(jnp.dot(h.astype(jnp.bfloat16), w2,
                            preferred_element_type=jnp.float32) + b2, 0.0)
    return jnp.tanh(jnp.dot(h.astype(jnp.bfloat16), w3,
                            preferred_element_type=jnp.float32) + b3)


if __name__ == "__main__":
    key = jax.random.PRNGKey(0)
    k_obs, k_params, k_obs2 = jax.random.split(key, 3)

    batch = 2
    state_dim = 16
    action_dim = 8

    params = make_actor_params(k_params, state_dim, action_dim)

    # Case 1: tiny batch (single padded tile).
    obs = jax.random.normal(k_obs, (batch, state_dim), jnp.float32)
    out = jax.block_until_ready(actor_forward(obs, params))
    ref = actor_reference(obs, params)
    assert out.shape == (batch, action_dim)
    assert jnp.allclose(out, ref, atol=1e-4, rtol=1e-4), "Pallas kernel mismatch (B=2)"

    # Case 2: exercise the multi-tile grid + batch padding path.
    obs2 = jax.random.normal(k_obs2, (20, state_dim), jnp.float32)
    out2 = jax.block_until_ready(actor_forward(obs2, params, block_b=8))
    ref2 = actor_reference(obs2, params)
    assert out2.shape == (20, action_dim)
    assert jnp.allclose(out2, ref2, atol=1e-4, rtol=1e-4), "Pallas kernel mismatch (B=20)"

    print("KERNEL_OK")
</pallas_src>

<mosaic_0001>
module attributes {stable_mosaic.version = 11 : i64} {
  func.func @actor_kernel(%arg0: i32, %arg1: memref<8x16xf32, #tpu.memory_space<vmem>>, %arg2: memref<16x256xbf16, #tpu.memory_space<vmem>>, %arg3: memref<1x256xf32, #tpu.memory_space<vmem>>, %arg4: memref<256x256xbf16, #tpu.memory_space<vmem>>, %arg5: memref<1x256xf32, #tpu.memory_space<vmem>>, %arg6: memref<256x8xbf16, #tpu.memory_space<vmem>>, %arg7: memref<1x8xf32, #tpu.memory_space<vmem>>, %arg8: memref<8x8xf32, #tpu.memory_space<vmem>>) attributes {dimension_semantics = [#tpu.dimension_semantics<parallel>], iteration_bounds = array<i64: 1>, scalar_prefetch = 0 : i64, scratch_operands = 0 : i64, tpu.core_type = #tpu.core_type<tc>, window_params = [{transform_indices = @transform_0, window_bounds = array<i64: 8, 16>}, {pipeline_mode = #tpu.pipeline_mode<synchronous>, transform_indices = @transform_1, window_bounds = array<i64: 16, 256>}, {pipeline_mode = #tpu.pipeline_mode<synchronous>, transform_indices = @transform_2, window_bounds = array<i64: 1, 256>}, {pipeline_mode = #tpu.pipeline_mode<synchronous>, transform_indices = @transform_3, window_bounds = array<i64: 256, 256>}, {pipeline_mode = #tpu.pipeline_mode<synchronous>, transform_indices = @transform_4, window_bounds = array<i64: 1, 256>}, {pipeline_mode = #tpu.pipeline_mode<synchronous>, transform_indices = @transform_5, window_bounds = array<i64: 256, 8>}, {pipeline_mode = #tpu.pipeline_mode<synchronous>, transform_indices = @transform_6, window_bounds = array<i64: 1, 8>}, {transform_indices = @transform_7, window_bounds = array<i64: 8, 8>}]} {
    %c0 = arith.constant 0 : index
    %c0_0 = arith.constant 0 : index
    %0 = vector.load %arg1[%c0, %c0_0] : memref<8x16xf32, #tpu.memory_space<vmem>>, vector<8x16xf32>
    %1 = arith.truncf %0 : vector<8x16xf32> to vector<8x16xbf16>
    %c0_1 = arith.constant 0 : index
    %c0_2 = arith.constant 0 : index
    %2 = vector.load %arg2[%c0_1, %c0_2] : memref<16x256xbf16, #tpu.memory_space<vmem>>, vector<16x256xbf16>
    %cst = arith.constant dense<0.000000e+00> : vector<8x256xf32>
    %3 = tpu.matmul %1, %2, %cst {dimension_numbers = #tpu.dot_dimension_numbers<[1], [0], [0], [1], [0, 0, 1, 1], [], []>} : vector<8x16xbf16>, vector<16x256xbf16>, vector<8x256xf32> -> vector<8x256xf32>
    %c0_3 = arith.constant 0 : index
    %c0_4 = arith.constant 0 : index
    %4 = vector.load %arg3[%c0_3, %c0_4] : memref<1x256xf32, #tpu.memory_space<vmem>>, vector<1x256xf32>
    %5 = vector.broadcast %4 : vector<1x256xf32> to vector<8x256xf32>
    %6 = arith.addf %3, %5 : vector<8x256xf32>
    %cst_5 = arith.constant 0.000000e+00 : f32
    %7 = vector.broadcast %cst_5 : f32 to vector<8x256xf32>
    %8 = arith.maximumf %6, %7 : vector<8x256xf32>
    %9 = arith.truncf %8 : vector<8x256xf32> to vector<8x256xbf16>
    %c0_6 = arith.constant 0 : index
    %c0_7 = arith.constant 0 : index
    %10 = vector.load %arg4[%c0_6, %c0_7] : memref<256x256xbf16, #tpu.memory_space<vmem>>, vector<256x256xbf16>
    %cst_8 = arith.constant dense<0.000000e+00> : vector<8x256xf32>
    %11 = tpu.matmul %9, %10, %cst_8 {dimension_numbers = #tpu.dot_dimension_numbers<[1], [0], [0], [1], [0, 0, 1, 1], [], []>} : vector<8x256xbf16>, vector<256x256xbf16>, vector<8x256xf32> -> vector<8x256xf32>
    %c0_9 = arith.constant 0 : index
    %c0_10 = arith.constant 0 : index
    %12 = vector.load %arg5[%c0_9, %c0_10] : memref<1x256xf32, #tpu.memory_space<vmem>>, vector<1x256xf32>
    %13 = vector.broadcast %12 : vector<1x256xf32> to vector<8x256xf32>
    %14 = arith.addf %11, %13 : vector<8x256xf32>
    %cst_11 = arith.constant 0.000000e+00 : f32
    %15 = vector.broadcast %cst_11 : f32 to vector<8x256xf32>
    %16 = arith.maximumf %14, %15 : vector<8x256xf32>
    %17 = arith.truncf %16 : vector<8x256xf32> to vector<8x256xbf16>
    %c0_12 = arith.constant 0 : index
    %c0_13 = arith.constant 0 : index
    %18 = vector.load %arg6[%c0_12, %c0_13] : memref<256x8xbf16, #tpu.memory_space<vmem>>, vector<256x8xbf16>
    %cst_14 = arith.constant dense<0.000000e+00> : vector<8x8xf32>
    %19 = tpu.matmul %17, %18, %cst_14 {dimension_numbers = #tpu.dot_dimension_numbers<[1], [0], [0], [1], [0, 0, 1, 1], [], []>} : vector<8x256xbf16>, vector<256x8xbf16>, vector<8x8xf32> -> vector<8x8xf32>
    %c0_15 = arith.constant 0 : index
    %c0_16 = arith.constant 0 : index
    %20 = vector.load %arg7[%c0_15, %c0_16] : memref<1x8xf32, #tpu.memory_space<vmem>>, vector<1x8xf32>
    %21 = vector.broadcast %20 : vector<1x8xf32> to vector<8x8xf32>
    %22 = arith.addf %19, %21 : vector<8x8xf32>
    %23 = math.tanh %22 : vector<8x8xf32>
    %c0_17 = arith.constant 0 : index
    %c0_18 = arith.constant 0 : index
    %24 = vector.load %arg8[%c0_17, %c0_18] : memref<8x8xf32, #tpu.memory_space<vmem>>, vector<8x8xf32>
    tpu.vector_store %arg8[%c0_17, %c0_18], %23 {strides = array<i32>} : memref<8x8xf32, #tpu.memory_space<vmem>>, vector<8x8xf32>,
    return
  }
  func.func @transform_0(%arg0: i32) -> (i32, i32) {
    %c0_i32 = arith.constant 0 : i32
    %c0_i32_0 = arith.constant 0 : i32
    return %arg0, %c0_i32 : i32, i32
  }
  func.func @transform_1(%arg0: i32) -> (i32, i32) {
    %c0_i32 = arith.constant 0 : i32
    %c0_i32_0 = arith.constant 0 : i32
    %c0_i32_1 = arith.constant 0 : i32
    return %c0_i32, %c0_i32_0 : i32, i32
  }
  func.func @transform_2(%arg0: i32) -> (i32, i32) {
    %c0_i32 = arith.constant 0 : i32
    %c0_i32_0 = arith.constant 0 : i32
    %c0_i32_1 = arith.constant 0 : i32
    return %c0_i32, %c0_i32_0 : i32, i32
  }
  func.func @transform_3(%arg0: i32) -> (i32, i32) {
    %c0_i32 = arith.constant 0 : i32
    %c0_i32_0 = arith.constant 0 : i32
    %c0_i32_1 = arith.constant 0 : i32
    return %c0_i32, %c0_i32_0 : i32, i32
  }
  func.func @transform_4(%arg0: i32) -> (i32, i32) {
    %c0_i32 = arith.constant 0 : i32
    %c0_i32_0 = arith.constant 0 : i32
    %c0_i32_1 = arith.constant 0 : i32
    return %c0_i32, %c0_i32_0 : i32, i32
  }
  func.func @transform_5(%arg0: i32) -> (i32, i32) {
    %c0_i32 = arith.constant 0 : i32
    %c0_i32_0 = arith.constant 0 : i32
    %c0_i32_1 = arith.constant 0 : i32
    return %c0_i32, %c0_i32_0 : i32, i32
  }
  func.func @transform_6(%arg0: i32) -> (i32, i32) {
    %c0_i32 = arith.constant 0 : i32
    %c0_i32_0 = arith.constant 0 : i32
    %c0_i32_1 = arith.constant 0 : i32
    return %c0_i32, %c0_i32_0 : i32, i32
  }
  func.func @transform_7(%arg0: i32) -> (i32, i32) {
    %c0_i32 = arith.constant 0 : i32
    %c0_i32_0 = arith.constant 0 : i32
    return %arg0, %c0_i32 : i32, i32
  }
}

</mosaic_0001>

<bundles_post_ra>
// kernel: tpu_custom_call.1
= control target key start
LH: loop header
LB: loop body
LE: loop exit
PB: predicated region body
PF: predicated region fallthrough
CT: control target
= control target key end

     0   :  { %12 = vsyncpa [#allocation3], 0  ;;  %s868_s0 = inlined_call_operand.vmem [shape: f32[8,16], index: 0, kind: input, shape index: {}]   ;;  %s869_s1 = inlined_call_operand.vmem [shape: bf16[16,256], index: 1, kind: input, shape index: {}]   ;;  %s870_s2 = inlined_call_operand.vmem [shape: f32[1,256], index: 2, kind: input, shape index: {}]   ;;  %s871_s3 = inlined_call_operand.hbm [shape: bf16[256,256], index: 3, kind: input, shape index: {}]   ;;  %s872_s4 = inlined_call_operand.vmem [shape: f32[1,256], index: 4, kind: input, shape index: {}]   ;;  %s873_s5 = inlined_call_operand.vmem [shape: bf16[256,8], index: 5, kind: input, shape index: {}]   ;;  %s874_s6 = inlined_call_operand.vmem [shape: f32[1,8], index: 6, kind: input, shape index: {}]   ;;  %s875_s7 = inlined_call_operand.hbm [shape: f32[8,8], index: 7, kind: output, shape index: {}]  }
   0x1   :  { %13 = vsyncpa [#allocation4], 0  ;;  %s751_s24 = smov [#allocation2]  }
   0x2   :  { %s25_s25 = sshll.u32 %s751_s24, 4  ;;  %s26_s25 = int_to_ptr.vmem [resolvable:$true] %s25_s25 }
   0x3   :  { %s715_s26 = scalar_lea.vmem %s26_s25, 4096  ;;  %p720_p1 = scmp.lt.s32.totalorder %s26_s25, %s26_s25 }
   0x4   :  { %p716_p0 = scmp.ne.s32.totalorder %s26_s25, %s715_s26  ;;  %p721_p2 = scmp.lt.s32.totalorder %s715_s26, %s715_s26 }
   0x6   :  { %p722_p3 = por %p721_p2, %p720_p1 }
   0x8   :  { %p723_p4 = pnand %p722_p3, %p716_p0 }
   0xa   :  { %726 = shalt.err (!%p723_p4)
}
   0xb   :  { %s752_s27 = smov 128   ;;  %s753_s28 = smov 8  }
   0xc   :  { %31 = dma.hbm_to_vmem [thread:$0]  %s871_s3, 4096, %s26_s25, [#allocation3], %s752_s27, %s752_s27, %s753_s28  }
   0xd   :  { %747 = dma.done.wait [#allocation3], 4096  }
   0xe   :  { %748 = vsyncadd [#allocation3], 4294963200  ;;  %v754_v0 = vmov 0   ;;  %v638_v1 = vld [vmem:[%s869_s1 + $0x4] ss:$8 sps:$4 sm:$0xff]   ;;  %vm68_vm0 = vcmask 130048   ;;  %v48_v49 = vlaneseq }
   0xf   :  { %104 = vmatprep.mubr.bf16.mxu0 %v754_v0  ;;  %v640_v2 = vld [vmem:[%s869_s1] ss:$8 sps:$4 sm:$0xff]   ;;  %86 = vmatprep.subr.bf16.mxu0 %v638_v1  ;;  %v641_v5 = vld [vmem:[#allocation2 + $0x74] ss:$8 sps:$4 sm:$0xff]   ;;  %v643_v6 = vld [vmem:[#allocation2 + $0x70] ss:$8 sps:$4 sm:$0xff]  }
  0x10   :  { %v42_v3 = vld [vmem:[%s868_s0] sm:$0xff]  ;;  %87 = vmatpush1.bf16.msra.mxu0 %v640_v2  ;;  %321 = vmatprep.subr.bf16.mxu1 %v641_v5  ;;  %v647_v9 = vld [vmem:[#allocation2 + $0x54] ss:$8 sps:$4 sm:$0xff]   ;;  %v649_v10 = vld [vmem:[#allocation2 + $0x50] ss:$8 sps:$4 sm:$0xff]   ;;  %v49_v50 = vshrl.u32 %v48_v49, 7 }
  0x11   :  { %v43_v4 = vpack.c.bf16 %v42_v3, %v42_v3  ;;  %v644_v7 = vld [vmem:[#allocation2 + $0x64] ss:$8 sps:$4 sm:$0xff]   ;;  %322 = vmatpush1.bf16.msra.mxu1 %v643_v6  ;;  %v646_v8 = vld [vmem:[#allocation2 + $0x60] ss:$8 sps:$4 sm:$0xff]   ;;  %v653_v13 = vld [vmem:[#allocation2 + $0x34] ss:$8 sps:$4 sm:$0xff]  }
  0x12   :  { %323 = vmatprep.subr.bf16.mxu1 %v644_v7  ;;  %v650_v11 = vld [vmem:[#allocation2 + $0x44] ss:$8 sps:$4 sm:$0xff]   ;;  %v652_v12 = vld [vmem:[#allocation2 + $0x40] ss:$8 sps:$4 sm:$0xff]   ;;  %v655_v14 = vld [vmem:[#allocation2 + $0x30] ss:$8 sps:$4 sm:$0xff]  }
  0x13   :  { %561 = vmatmul.mubr.msk.bf16.vlgmr.msra.gmra.mxu0 %vm68_vm0, %v43_v4  ;;  %v656_v15 = vld [vmem:[#allocation2 + $0x24] ss:$8 sps:$4 sm:$0xff]   ;;  %v658_v16 = vld [vmem:[#allocation2 + $0x20] ss:$8 sps:$4 sm:$0xff]   ;;  %v659_v17 = vld [vmem:[#allocation2 + $0x14] ss:$8 sps:$4 sm:$0xff]  }
  0x14   :  { %v661_v18 = vld [vmem:[#allocation2 + $0x10] ss:$8 sps:$4 sm:$0xff]   ;;  %v662_v19 = vld [vmem:[#allocation2 + $0x4] ss:$8 sps:$4 sm:$0xff]   ;;  %v664_v20 = vld [vmem:[#allocation2] ss:$8 sps:$4 sm:$0xff]  }
  0x15   :  { %324 = vmatpush1.bf16.msra.mxu1 %v646_v8  ;;  %v665_v21 = vld [vmem:[#allocation2 + $0xf4] ss:$8 sps:$4 sm:$0xff]   ;;  %v667_v22 = vld [vmem:[#allocation2 + $0xf0] ss:$8 sps:$4 sm:$0xff]   ;;  %v668_v23 = vld [vmem:[#allocation2 + $0xe4] ss:$8 sps:$4 sm:$0xff]  }
  0x16   :  { %325 = vmatprep.subr.bf16.mxu1 %v647_v9  ;;  %v670_v24 = vld [vmem:[#allocation2 + $0xe0] ss:$8 sps:$4 sm:$0xff]   ;;  %v671_v25 = vld [vmem:[#allocation2 + $0xd4] ss:$8 sps:$4 sm:$0xff]   ;;  %v673_v26 = vld [vmem:[#allocation2 + $0xd0] ss:$8 sps:$4 sm:$0xff]  }
  0x17   :  { %v674_v27 = vld [vmem:[#allocation2 + $0xc4] ss:$8 sps:$4 sm:$0xff]   ;;  %v676_v28 = vld [vmem:[#allocation2 + $0xc0] ss:$8 sps:$4 sm:$0xff]   ;;  %v677_v29 = vld [vmem:[#allocation2 + $0xb4] ss:$8 sps:$4 sm:$0xff]  }
  0x18   :  { %v679_v30 = vld [vmem:[#allocation2 + $0xb0] ss:$8 sps:$4 sm:$0xff]   ;;  %v680_v31 = vld [vmem:[#allocation2 + $0xa4] ss:$8 sps:$4 sm:$0xff]   ;;  %v682_v32 = vld [vmem:[#allocation2 + $0xa0] ss:$8 sps:$4 sm:$0xff]  }
  0x19   :  { %326 = vmatpush1.bf16.msra.mxu1 %v649_v10  ;;  %v683_v33 = vld [vmem:[#allocation2 + $0x94] ss:$8 sps:$4 sm:$0xff]   ;;  %v685_v34 = vld [vmem:[#allocation2 + $0x90] ss:$8 sps:$4 sm:$0xff]   ;;  %v686_v35 = vld [vmem:[#allocation2 + $0x84] ss:$8 sps:$4 sm:$0xff]  }
  0x1a   :  { %327 = vmatprep.subr.bf16.mxu1 %v650_v11  ;;  %v688_v36 = vld [vmem:[#allocation2 + $0x80] ss:$8 sps:$4 sm:$0xff]   ;;  %v689_v37 = vld [vmem:[%s873_s5 + $0x78] sm:$0xff]   ;;  %v691_v39 = vld [vmem:[%s873_s5 + $0x70] sm:$0xff]   ;;  %v50_v51 = vsub.s32 0, %v49_v50  ;;  %v54_v53 = vsub.s32 1, %v49_v50 }
  0x1b   :  { %v690_v38 = vld [vmem:[%s873_s5 + $0x38] sm:$0xff]   ;;  %611 = vmatprep.subr.bf16.mxu0 %v689_v37  ;;  %v692_v40 = vld [vmem:[%s873_s5 + $0x30] sm:$0xff]   ;;  %v693_v41 = vld [vmem:[%s873_s5 + $0x68] sm:$0xff]   ;;  %vm542_vm1 = vcmask 64512  }
  0x1c   :  { %612 = vmatpush3.bf16.msra.mxu0 %v690_v38  ;;  %v694_v42 = vld [vmem:[%s873_s5 + $0x28] sm:$0xff]   ;;  %v695_v43 = vld [vmem:[%s873_s5 + $0x60] sm:$0xff]   ;;  %v697_v45 = vld [vmem:[%s873_s5 + $0x58] sm:$0xff]  }
  0x1d   :  { %328 = vmatpush1.bf16.msra.mxu1 %v652_v12  ;;  %613 = vmatprep.subr.bf16.mxu0 %v691_v39  ;;  %v696_v44 = vld [vmem:[%s873_s5 + $0x20] sm:$0xff]   ;;  %v698_v46 = vld [vmem:[%s873_s5 + $0x18] sm:$0xff]   ;;  %v699_v47 = vld [vmem:[%s873_s5 + $0x50] sm:$0xff]  }
  0x1e   :  { %329 = vmatprep.subr.bf16.mxu1 %v653_v13  ;;  %v700_v48 = vld [vmem:[%s873_s5 + $0x10] sm:$0xff]   ;;  %v46_v52 = vld [vmem:[%s870_s2] sm:$0x3]  ;;  %v701_v2 = vld [vmem:[%s873_s5 + $0x48] sm:$0xff]  }
  0x1f   :  { %v51_v54 = vrot.slane %v46_v52, %v50_v51  ;;  %v55_v55 = vrot.slane %v46_v52, %v54_v53  ;;  %v702_v3 = vld [vmem:[%s873_s5 + $0x8] sm:$0xff]   ;;  %v703_v4 = vld [vmem:[%s873_s5 + $0x40] sm:$0xff]  }
  0x20   :  { %614 = vmatpush3.bf16.msra.mxu0 %v692_v40  ;;  %v704_v5 = vld [vmem:[%s873_s5] sm:$0xff]  }
  0x21   :  { %330 = vmatpush1.bf16.msra.mxu1 %v655_v14  ;;  %615 = vmatprep.subr.bf16.mxu0 %v693_v41  ;;  %v149_v6 = vld [vmem:[%s872_s4] sm:$0x3]  ;;  %s755_s4 = smov [#allocation5]  }
  0x22   :  { %331 = vmatprep.subr.bf16.mxu1 %v656_v15  ;;  %v154_v7 = vrot.slane %v149_v6, %v50_v51  ;;  %v158_v8 = vrot.slane %v149_v6, %v54_v53  ;;  %s550_s21 = sshll.u32 %s755_s4, 4  ;;  %s551_s21 = int_to_ptr.vmem [resolvable:$true] %s550_s21 }
  0x23   :  { %s727_s22 = scalar_lea.vmem %s551_s21, 128  ;;  %p732_p6 = scmp.lt.s32.totalorder %s551_s21, %s551_s21 }
  0x24   :  { %616 = vmatpush3.bf16.msra.mxu0 %v694_v42  ;;  %p728_p5 = scmp.ne.s32.totalorder %s551_s21, %s727_s22  ;;  %p733_p7 = scmp.lt.s32.totalorder %s727_s22, %s727_s22 }
  0x25   :  { %332 = vmatpush1.bf16.msra.mxu1 %v658_v16  ;;  %617 = vmatprep.subr.bf16.mxu0 %v695_v43 }
  0x26   :  { %333 = vmatprep.subr.bf16.mxu1 %v659_v17  ;;  %p734_p8 = por %p733_p7, %p732_p6 }
  0x28   :  { %618 = vmatpush3.bf16.msra.mxu0 %v696_v44  ;;  %p735_p9 = pnand %p734_p8, %p728_p5 }
  0x29   :  { %334 = vmatpush1.bf16.msra.mxu1 %v661_v18  ;;  %619 = vmatprep.subr.bf16.mxu0 %v697_v45 }
  0x2a   :  { %335 = vmatprep.subr.bf16.mxu1 %v662_v19 }
  0x2c   :  { %620 = vmatpush3.bf16.msra.mxu0 %v698_v46 }
  0x2d   :  { %336 = vmatpush1.bf16.msra.mxu1 %v664_v20  ;;  %621 = vmatprep.subr.bf16.mxu0 %v699_v47  ;;  %v594_v20 = vld [vmem:[%s874_s6] ss:$0 sm:$0xff] }
  0x2e   :  { %337 = vmatprep.subr.bf16.mxu1 %v665_v21 }
  0x30   :  { %622 = vmatpush3.bf16.msra.mxu0 %v700_v48 }
  0x31   :  { %338 = vmatpush2.bf16.msra.mxu1 %v667_v22  ;;  %623 = vmatprep.subr.bf16.mxu0 %v701_v2 }
  0x32   :  { %339 = vmatprep.subr.bf16.mxu1 %v668_v23 }
  0x34   :  { %624 = vmatpush3.bf16.msra.mxu0 %v702_v3 }
  0x35   :  { %340 = vmatpush2.bf16.msra.mxu1 %v670_v24  ;;  %625 = vmatprep.subr.bf16.mxu0 %v703_v4 }
  0x36   :  { %341 = vmatprep.subr.bf16.mxu1 %v671_v25 }
  0x38   :  { %626 = vmatpush3.bf16.msra.mxu0 %v704_v5 }
  0x39   :  { %342 = vmatpush2.bf16.msra.mxu1 %v673_v26 }
  0x3a   :  { %343 = vmatprep.subr.bf16.mxu1 %v674_v27 }
  0x3d   :  { %344 = vmatpush2.bf16.msra.mxu1 %v676_v28 }
  0x3e   :  { %345 = vmatprep.subr.bf16.mxu1 %v677_v29 }
  0x41   :  { %346 = vmatpush2.bf16.msra.mxu1 %v679_v30 }
  0x42   :  { %347 = vmatprep.subr.bf16.mxu1 %v680_v31 }
  0x45   :  { %348 = vmatpush2.bf16.msra.mxu1 %v682_v32 }
  0x46   :  { %349 = vmatprep.subr.bf16.mxu1 %v683_v33 }
  0x49   :  { %350 = vmatpush2.bf16.msra.mxu1 %v685_v34 }
  0x4a   :  { %351 = vmatprep.subr.bf16.mxu1 %v686_v35 }
  0x4d   :  { %352 = vmatpush2.bf16.msra.mxu1 %v688_v36 }
  0xd3   :  { %v106_v56 = vpop.f32.mrf.mxu0 }
  0xd4   :  { %v107_v57 = vadd.f32 %v106_v56, %v51_v54 }
  0xd5   :  { %v108_v58 = vpop.f32.mrf.mxu0 }
  0xd6   :  { %v109_v59 = vadd.f32 %v108_v58, %v55_v55  ;;  %v113_v60 = vmax.f32 %v107_v57, 0.0 }
  0xd7   :  { %v110_v61 = vpop.f32.mrf.mxu0 }
  0xd8   :  { %v114_v62 = vmax.f32 %v109_v59, 0.0  ;;  %v115_v1 = vpack.c.bf16 %v113_v60, %v113_v60 }
  0xd9   :  { %v111_v63 = vpop.f32.mrf.mxu0 }
  0xda   :  { %v116_v0 = vpack.c.bf16 %v114_v62, %v114_v62 }
  0xdc   :  { %353 = vmatprep.mubr.bf16.mxu1 %v116_v0 }
  0xdd   :  { %354 = vmatmul.mubr.bf16.vlgmr.msra.gmra.mxu1 %v115_v1 }
 0x19d   :  { %v355_v9 = vpop.f32.mrf.mxu1 }
 0x19e   :  { %v356_v10 = vadd.f32 %v355_v9, %v154_v7 }
 0x19f   :  { %v357_v11 = vpop.f32.mrf.mxu1 }
 0x1a0   :  { %v358_v12 = vadd.f32 %v357_v11, %v158_v8  ;;  %v362_v13 = vmax.f32 %v356_v10, 0.0 }
 0x1a1   :  { %v359_v14 = vpop.f32.mrf.mxu1 }
 0x1a2   :  { %v363_v15 = vmax.f32 %v358_v12, 0.0  ;;  %v364_v18 = vpack.c.bf16 %v362_v13, %v362_v13 }
 0x1a3   :  { %v360_v16 = vpop.f32.mrf.mxu1 }
 0x1a4   :  { %v365_v17 = vpack.c.bf16 %v363_v15, %v363_v15 }
 0x1a6   :  { %533 = vmatprep.mubr.bf16.mxu0 %v365_v17 }
 0x1a7   :  { %534 = vmatmul.mubr.bf16.vlgmr.msra.gmra.mxu0 %v364_v18 }
 0x267   :  { %v627_v19 = vpop.f32.mrf.mxu0 }
 0x269   :  { %v628_v21 = vpop.f32.mrf.mxu0 }
 0x26a   :  { %v629_v22 = vadd.f32 %v628_v21, %v627_v19 }
 0x26b   :  { %v630_v23 = vpop.f32.mrf.mxu0 }
 0x26c   :  { %v536_v24 = vadd.f32 %v629_v22, %v594_v20 }
 0x26d   :  { %v631_v25 = vpop.f32.mrf.mxu0 }
 0x26e   :  { %705 = vtanh.f32 %v536_v24 }
 0x27b   :  { %v706_v26 = vpop.eup %705 }
 0x27c   :  { %543 = vst.msk [vmem:[#allocation5] sm:$0xff] %vm542_vm1, %v706_v26 }
 0x27d   :  { %738 = shalt.err (!%p735_p9)
}
 0x27e   :  { %553 = dma.vmem_to_hbm [thread:$0]  %s551_s21, 128, %s875_s7, [#allocation4]  }
 0x27f   :  { %749 = dma.done.wait [#allocation4], 128  }
 0x280   :  { %750 = vsyncadd [#allocation4], 4294967168 }
 0x281   :  { %557 = vsyncpa [#allocation3], 1 }
 0x282   :  { %558 = vsyncpa [#allocation4], 1 }

</bundles_post_ra>
